<compile_context>
chip_gen: v5e
topology: v5e:2x2
jax: 0.10.0
libtpu: 0.0.40
codegen_flags: <defaults>
</compile_context>

<pallas_src>
import functools
import math

import jax
import jax.numpy as jnp
from jax import lax
from jax.experimental import pallas as pl
from jax.experimental.pallas import tpu as pltpu

MAX_BONDS = 6
MAX_DIFF = 4            # == num_heads of MultiheadAttention(dim, MAX_DIFF)

_NEG = -1e30            # stand-in for -inf in the key-padding mask.  Differs from torch
                        # only when an entire key row is masked (uniform weights instead
                        # of NaN); pad_mask zeroes those rows so the output matches.


def _round_up(x, m):
    return ((x + m - 1) // m) * m


# ----------------------------------------------------------------------------- kernel
def bond_decoder_kernel(x_ref, mrow_ref, mcol_ref, bond_ref, w_ref, b_ref, out_ref,
                        *, dim, n_heads, step, compute_dtype):
    bt, l, _ = x_ref.shape
    hd = dim // n_heads

    # One fused projection (1/sqrt(hd) already folded into the q columns of w/b):
    #   (bt*l, dim) @ (dim, 4*dim) -> [q_inc | k_inc | q_dec | k_dec]
    x2 = x_ref[...].reshape(bt * l, dim).astype(compute_dtype)
    proj = jnp.dot(x2, w_ref[...], preferred_element_type=jnp.float32) + b_ref[...]
    proj = proj.reshape(bt, l, 4 * dim)

    mrow = mrow_ref[...]                          # (bt, 1, l); 1.0 == masked key
    neg_bias = mrow * _NEG

    dn = (((2,), (2,)), ((0,), (0,)))             # contract head_dim, batch over bt

    # Online per-head softmax accumulated straight into the signed head sum.
    # mean-over-heads (1/MAX_DIFF) and the later *MAX_DIFF cancel -> plain +/- sums.
    diff = None
    for br in range(2):                           # 0 = inc branch, 1 = dec branch
        q_off = 2 * br * dim
        k_off = q_off + dim
        for h in range(n_heads):
            q = proj[:, :, q_off + h * hd: q_off + (h + 1) * hd].astype(compute_dtype)
            k = proj[:, :, k_off + h * hd: k_off + (h + 1) * hd].astype(compute_dtype)
            s = lax.dot_general(q, k, dn, preferred_element_type=jnp.float32) + neg_bias
            s = s - jnp.max(s, axis=-1, keepdims=True)
            e = jnp.exp(s)
            inv = 1.0 / jnp.sum(e, axis=-1, keepdims=True)   # exact; l divides, not l*l
            p = e * inv
            if diff is None:
                diff = p
            elif br == 0:
                diff = diff + p
            else:
                diff = diff - p

    scaled = diff if step == 1.0 else diff * step
    pad_row = 1.0 - mrow                          # (bt, 1, l)
    pad_col = 1.0 - mcol_ref[...]                 # (bt, l, 1)
    out_ref[...] = (bond_ref[...] + scaled) * pad_row * pad_col


# ---------------------------------------------------------------------------- wrapper
def _fuse_params(params, dim, compute_dtype):
    """Fuse qk Linear + MHA in_proj (q/k rows) into one pre-transposed (dim, 4*dim)
    weight [q_inc|k_inc|q_dec|k_dec] + (1, 4*dim) bias, with the 1/sqrt(head_dim)
    score scale folded into the q columns (one-time wrapper work, zero kernel cost)."""
    hp = lax.Precision.HIGHEST                    # one-time fusion in full f32
    scale = 1.0 / math.sqrt(dim // MAX_DIFF)

    def fuse(w_in, w_qk):                         # (dim,dim) @ (dim,dim)
        return jnp.dot(w_in, w_qk, precision=hp)

    wq_inc = fuse(params["inc_in_proj_w"][:dim],          params["inc_qk_w"][:dim]) * scale
    wk_inc = fuse(params["inc_in_proj_w"][dim:2 * dim],   params["inc_qk_w"][dim:2 * dim])
    wq_dec = fuse(params["dec_in_proj_w"][:dim],          params["dec_qk_w"][:dim]) * scale
    wk_dec = fuse(params["dec_in_proj_w"][dim:2 * dim],   params["dec_qk_w"][dim:2 * dim])

    b_inc, b_dec = params["inc_in_proj_b"], params["dec_in_proj_b"]
    w_all = jnp.concatenate([wq_inc.T, wk_inc.T, wq_dec.T, wk_dec.T], axis=1)  # (dim, 4*dim)
    b_all = jnp.concatenate([b_inc[:dim] * scale, b_inc[dim:2 * dim],
                             b_dec[:dim] * scale, b_dec[dim:2 * dim]]).reshape(1, 4 * dim)
    return w_all.astype(compute_dtype), b_all.astype(jnp.float32)


def _tpu_hardware():
    """(num_tensorcores_per_device, vmem_capacity_bytes) with conservative fallbacks."""
    n_cores, vmem = 1, None
    try:
        dev = jax.local_devices()[0]
        kind = str(getattr(dev, "device_kind", "")).lower()
        if any(t in kind for t in ("v7", "v5p", "v4")):
            n_cores = 2                           # dual-TensorCore / megacore parts
        nc = getattr(dev, "num_cores", None)
        if isinstance(nc, int) and nc > 0:
            n_cores = nc
        if "v7" in kind:
            vmem = 64 << 20
        elif any(t in kind for t in ("v4", "v5", "v6")):
            vmem = 128 << 20
    except Exception:
        pass
    try:
        v = getattr(pltpu.get_tpu_info(), "vmem_capacity_bytes", None)
        if v:
            vmem = int(v)
    except Exception:
        pass
    if vmem is None:
        vmem = 64 << 20                           # conservative (fits every generation)
    return n_cores, vmem


def _step_footprint_bytes(bt, l_pad, dim, x_bytes, w_bytes, weight_buffers):
    """Approximate per-grid-step VMEM footprint: pipelined blocks (x2 buffers) plus the
    kernel's live intermediates (one score block at a time thanks to the online softmax)."""
    f32 = 4
    ll = _round_up(l_pad, 128)                    # lane-padded seq length in VMEM
    dl = _round_up(dim, 128)
    n = 2 * bt * l_pad * dl * x_bytes             # x block
    n += 2 * bt * 8 * ll * f32                    # row-form mask block (sublane-padded)
    n += 2 * bt * l_pad * 128 * f32               # col-form mask block (lane-padded)
    n += 4 * bt * l_pad * ll * f32                # bond + out blocks
    n += weight_buffers * 4 * (dim + 8) * dl * w_bytes   # fused weight + bias
    n += bt * l_pad * 4 * dl * f32                # live: fused projection
    n += 4 * bt * l_pad * ll * f32                # live: score/exp/prob + diff accumulator
    return n


def _pick_b_tile(b, l_pad, dim, budget_bytes, n_cores, x_bytes, w_bytes, weight_buffers):
    """Largest batch tile that (a) divides b, (b) keeps >=2 grid steps per TensorCore on
    multi-core parts (no forced split on single-core v5e/v6e), and (c) fits the budget."""
    min_steps = 2 * n_cores if n_cores > 1 else 1
    max_bt = max(1, b // min_steps)
    best = 1
    for bt in range(1, max_bt + 1):
        if b % bt:
            continue
        if _step_footprint_bytes(bt, l_pad, dim, x_bytes, w_bytes,
                                 weight_buffers) <= budget_bytes:
            best = bt
    return best


def bond_decoder_forward(molecule_embedding, src_bond, src_mask, params, step=1.0,
                         compute_dtype=jnp.float32):
    """molecule_embedding: [l, b, dim] (torch layout); src_mask: [b, l] bool (True==masked);
    src_bond: dense [b, l, l].  Returns pred_weight [b, l, l] float32."""
    l, b, dim = molecule_embedding.shape
    assert dim % MAX_DIFF == 0

    # Pad seq axis: sublane multiple always; lane-dense (128) when l is big enough that
    # unmasked vector stores pay for the extra compute.
    l_pad = _round_up(l, 128) if l > 64 else _round_up(l, 8)

    x = jnp.transpose(molecule_embedding, (1, 0, 2)).astype(jnp.float32)   # (b, l, dim)
    maskf = src_mask.astype(jnp.float32)
    bond = src_bond.astype(jnp.float32)
    if l_pad != l:
        x = jnp.pad(x, ((0, 0), (0, l_pad - l), (0, 0)))
        maskf = jnp.pad(maskf, ((0, 0), (0, l_pad - l)), constant_values=1.0)  # pad==masked
        bond = jnp.pad(bond, ((0, 0), (0, l_pad - l), (0, l_pad - l)))

    mrow = maskf.reshape(b, 1, l_pad)
    mcol = maskf.reshape(b, l_pad, 1)

    w_all, b_all = _fuse_params(params, dim, compute_dtype)
    if compute_dtype != jnp.float32:
        x = x.astype(compute_dtype)
    x_bytes = jnp.dtype(compute_dtype).itemsize
    w_bytes = x_bytes

    # Single-buffer the constant-index fused weights once double-buffering them would
    # burn meaningful VMEM (2*16*dim^2 bytes, e.g. 32 MiB at dim=1024 -> half of v7x).
    weight_bytes = 4 * dim * dim * w_bytes
    weight_buffers = 1 if weight_bytes >= (2 << 20) else 2

    n_cores, vmem_cap = _tpu_hardware()
    vmem_limit = int(min(0.78 * vmem_cap, 100 * (1 << 20)))   # ~50 MiB v7x, ~100 MiB v5e/v6e
    budget = int(0.85 * vmem_limit)

    bt = _pick_b_tile(b, l_pad, dim, budget, n_cores, x_bytes, w_bytes, weight_buffers)
    grid = (b // bt,)

    kernel = functools.partial(bond_decoder_kernel, dim=dim, n_heads=MAX_DIFF,
                               step=float(step), compute_dtype=compute_dtype)

    batched = lambda i: (i, 0, 0)
    full2d = lambda i: (0, 0)
    w_kwargs = dict(pipeline_mode=pl.Buffered(1)) if weight_buffers == 1 else {}

    out = pl.pallas_call(
        kernel,
        out_shape=jax.ShapeDtypeStruct((b, l_pad, l_pad), jnp.float32),
        grid=grid,
        in_specs=[
            pl.BlockSpec((bt, l_pad, dim), batched),            # x
            pl.BlockSpec((bt, 1, l_pad), batched),              # mask (key / row form)
            pl.BlockSpec((bt, l_pad, 1), batched),              # mask (query / col form)
            pl.BlockSpec((bt, l_pad, l_pad), batched),          # src_bond (dense)
            pl.BlockSpec((dim, 4 * dim), full2d, **w_kwargs),   # fused q/k weights (inc|dec)
            pl.BlockSpec((1, 4 * dim), full2d, **w_kwargs),     # fused q/k bias    (inc|dec)
        ],
        out_specs=pl.BlockSpec((bt, l_pad, l_pad), batched),
        compiler_params=pltpu.CompilerParams(
            dimension_semantics=("parallel",),
            vmem_limit_bytes=vmem_limit),
    )(x, mrow, mcol, bond, w_all, b_all)

    if l_pad != l:
        out = out[:, :l, :l]
    return out


# TODO(synk): cls_layer / out_logits branch (per-head weights + _shift_probs + log), the
#             MAX_BONDS index_select one-hot src_bond branch, and tensor-valued `step`
#             (append_dims) are not implemented here.


# -------------------------------------------------------------------------- reference
def reference_forward(molecule_embedding, src_bond, src_mask, params, step=1.0):
    """Pure-JAX reference mirroring the PyTorch forward (same config)."""
    l, b, dim = molecule_embedding.shape
    x = jnp.transpose(molecule_embedding, (1, 0, 2)).astype(jnp.float32)
    maskf = src_mask.astype(jnp.float32)
    hd = dim // MAX_DIFF

    def attn(w_qk, w_in, b_in):
        q0 = x @ w_qk[:dim].T
        k0 = x @ w_qk[dim:].T
        q1 = q0 @ w_in[:dim].T + b_in[:dim]
        k1 = k0 @ w_in[dim:2 * dim].T + b_in[dim:2 * dim]
        qh = q1.reshape(b, l, MAX_DIFF, hd).transpose(0, 2, 1, 3)
        kh = k1.reshape(b, l, MAX_DIFF, hd).transpose(0, 2, 1, 3)
        s = jnp.einsum("bhqd,bhkd->bhqk", qh, kh) / math.sqrt(hd)
        s = s + (maskf * _NEG)[:, None, None, :]
        return jax.nn.softmax(s, axis=-1).mean(axis=1)

    inc = attn(params["inc_qk_w"], params["inc_in_proj_w"], params["inc_in_proj_b"])
    dec = attn(params["dec_qk_w"], params["dec_in_proj_w"], params["dec_in_proj_b"])
    pad = 1.0 - maskf
    pad2 = jnp.einsum("bl,bk->blk", pad, pad)
    diff = (inc - dec) * MAX_DIFF * pad2
    src_w = src_bond.astype(jnp.float32) * pad2
    return src_w + diff * step


if __name__ == "__main__":
    l, b, dim = 8, 2, 32  # seq len, batch, embedding dim (dim % MAX_DIFF == 0)

    key = jax.random.PRNGKey(0)
    ks = jax.random.split(key, 9)
    params = {
        "inc_qk_w":      0.1 * jax.random.normal(ks[0], (2 * dim, dim), jnp.float32),
        "inc_in_proj_w": 0.1 * jax.random.normal(ks[1], (3 * dim, dim), jnp.float32),
        "inc_in_proj_b": 0.1 * jax.random.normal(ks[2], (3 * dim,), jnp.float32),
        "dec_qk_w":      0.1 * jax.random.normal(ks[3], (2 * dim, dim), jnp.float32),
        "dec_in_proj_w": 0.1 * jax.random.normal(ks[4], (3 * dim, dim), jnp.float32),
        "dec_in_proj_b": 0.1 * jax.random.normal(ks[5], (3 * dim,), jnp.float32),
    }

    molecule_embedding = jax.random.normal(ks[6], (l, b, dim), jnp.float32)      # [l, b, dim]
    src_bond = (jax.random.uniform(ks[7], (b, l, l)) < 0.3).astype(jnp.float32)  # dense bonds
    src_mask = jnp.zeros((b, l), dtype=bool).at[1, l - 2:].set(True)             # True == masked

    out = bond_decoder_forward(molecule_embedding, src_bond, src_mask, params, step=1.0)
    out = jax.block_until_ready(out)

    ref = reference_forward(molecule_embedding, src_bond, src_mask, params, step=1.0)
    assert out.shape == (b, l, l)
    err = float(jnp.max(jnp.abs(out - ref)))
    assert jnp.allclose(out, ref, atol=1e-4, rtol=1e-4), err

    print("KERNEL_OK")
</pallas_src>

<mosaic_0001>
module attributes {stable_mosaic.version = 11 : i64} {
  func.func @bond_decoder_kernel(%arg0: i32, %arg1: memref<2x8x32xf32, #tpu.memory_space<vmem>>, %arg2: memref<2x1x8xf32, #tpu.memory_space<vmem>>, %arg3: memref<2x8x1xf32, #tpu.memory_space<vmem>>, %arg4: memref<2x8x8xf32, #tpu.memory_space<vmem>>, %arg5: memref<32x128xf32, #tpu.memory_space<vmem>>, %arg6: memref<1x128xf32, #tpu.memory_space<vmem>>, %arg7: memref<2x8x8xf32, #tpu.memory_space<vmem>>) attributes {dimension_semantics = [#tpu.dimension_semantics<parallel>], iteration_bounds = array<i64: 1>, scalar_prefetch = 0 : i64, scratch_operands = 0 : i64, tpu.core_type = #tpu.core_type<tc>, window_params = [{transform_indices = @transform_0, window_bounds = array<i64: 2, 8, 32>}, {transform_indices = @transform_1, window_bounds = array<i64: 2, 1, 8>}, {transform_indices = @transform_2, window_bounds = array<i64: 2, 8, 1>}, {transform_indices = @transform_3, window_bounds = array<i64: 2, 8, 8>}, {pipeline_mode = #tpu.pipeline_mode<synchronous>, transform_indices = @transform_4, window_bounds = array<i64: 32, 128>}, {pipeline_mode = #tpu.pipeline_mode<synchronous>, transform_indices = @transform_5, window_bounds = array<i64: 1, 128>}, {transform_indices = @transform_6, window_bounds = array<i64: 2, 8, 8>}]} {
    %c0 = arith.constant 0 : index
    %c0_0 = arith.constant 0 : index
    %c0_1 = arith.constant 0 : index
    %0 = vector.load %arg1[%c0, %c0_0, %c0_1] : memref<2x8x32xf32, #tpu.memory_space<vmem>>, vector<2x8x32xf32>
    %1 = vector.shape_cast %0 : vector<2x8x32xf32> to vector<16x32xf32>
    %c0_2 = arith.constant 0 : index
    %c0_3 = arith.constant 0 : index
    %2 = vector.load %arg5[%c0_2, %c0_3] : memref<32x128xf32, #tpu.memory_space<vmem>>, vector<32x128xf32>
    %cst = arith.constant dense<0.000000e+00> : vector<16x128xf32>
    %3 = tpu.matmul %1, %2, %cst {dimension_numbers = #tpu.dot_dimension_numbers<[1], [0], [0], [1], [0, 0, 1, 1], [], []>} : vector<16x32xf32>, vector<32x128xf32>, vector<16x128xf32> -> vector<16x128xf32>
    %c0_4 = arith.constant 0 : index
    %c0_5 = arith.constant 0 : index
    %4 = vector.load %arg6[%c0_4, %c0_5] : memref<1x128xf32, #tpu.memory_space<vmem>>, vector<1x128xf32>
    %5 = vector.broadcast %4 : vector<1x128xf32> to vector<16x128xf32>
    %6 = arith.addf %3, %5 : vector<16x128xf32>
    %7 = vector.shape_cast %6 : vector<16x128xf32> to vector<2x8x128xf32>
    %c0_6 = arith.constant 0 : index
    %c0_7 = arith.constant 0 : index
    %c0_8 = arith.constant 0 : index
    %8 = vector.load %arg2[%c0_6, %c0_7, %c0_8] : memref<2x1x8xf32, #tpu.memory_space<vmem>>, vector<2x1x8xf32>
    %cst_9 = arith.constant -1.000000e+30 : f32
    %9 = vector.broadcast %cst_9 : f32 to vector<2x1x8xf32>
    %10 = arith.mulf %8, %9 : vector<2x1x8xf32>
    %11 = vector.extract_strided_slice %7 {offsets = [0, 0, 0], sizes = [2, 8, 8], strides = [1, 1, 1]} : vector<2x8x128xf32> to vector<2x8x8xf32>
    %12 = vector.extract_strided_slice %7 {offsets = [0, 0, 32], sizes = [2, 8, 8], strides = [1, 1, 1]} : vector<2x8x128xf32> to vector<2x8x8xf32>
    %cst_10 = arith.constant dense<0.000000e+00> : vector<2x8x8xf32>
    %13 = tpu.matmul %11, %12, %cst_10 {dimension_numbers = #tpu.dot_dimension_numbers<[2], [2], [1], [1], [0, 0, 0, 1, 1, 1], [0], [0]>} : vector<2x8x8xf32>, vector<2x8x8xf32>, vector<2x8x8xf32> -> vector<2x8x8xf32>
    %14 = vector.broadcast %10 : vector<2x1x8xf32> to vector<2x8x8xf32>
    %15 = arith.addf %13, %14 : vector<2x8x8xf32>
    %cst_11 = arith.constant dense<0xFF800000> : vector<2x8xf32>
    %16 = vector.multi_reduction <maximumf>, %15, %cst_11 [2] : vector<2x8x8xf32> to vector<2x8xf32>
    %17 = vector.shape_cast %16 : vector<2x8xf32> to vector<2x8x1xf32>
    %18 = vector.broadcast %17 : vector<2x8x1xf32> to vector<2x8x8xf32>
    %19 = arith.subf %15, %18 : vector<2x8x8xf32>
    %20 = math.exp %19 : vector<2x8x8xf32>
    %cst_12 = arith.constant dense<0.000000e+00> : vector<2x8xf32>
    %21 = vector.multi_reduction <add>, %20, %cst_12 [2] : vector<2x8x8xf32> to vector<2x8xf32>
    %22 = vector.shape_cast %21 : vector<2x8xf32> to vector<2x8x1xf32>
    %cst_13 = arith.constant 1.000000e+00 : f32
    %23 = vector.broadcast %cst_13 : f32 to vector<2x8x1xf32>
    %24 = arith.divf %23, %22 : vector<2x8x1xf32>
    %25 = vector.broadcast %24 : vector<2x8x1xf32> to vector<2x8x8xf32>
    %26 = arith.mulf %20, %25 : vector<2x8x8xf32>
    %27 = vector.extract_strided_slice %7 {offsets = [0, 0, 8], sizes = [2, 8, 8], strides = [1, 1, 1]} : vector<2x8x128xf32> to vector<2x8x8xf32>
    %28 = vector.extract_strided_slice %7 {offsets = [0, 0, 40], sizes = [2, 8, 8], strides = [1, 1, 1]} : vector<2x8x128xf32> to vector<2x8x8xf32>
    %cst_14 = arith.constant dense<0.000000e+00> : vector<2x8x8xf32>
    %29 = tpu.matmul %27, %28, %cst_14 {dimension_numbers = #tpu.dot_dimension_numbers<[2], [2], [1], [1], [0, 0, 0, 1, 1, 1], [0], [0]>} : vector<2x8x8xf32>, vector<2x8x8xf32>, vector<2x8x8xf32> -> vector<2x8x8xf32>
    %30 = vector.broadcast %10 : vector<2x1x8xf32> to vector<2x8x8xf32>
    %31 = arith.addf %29, %30 : vector<2x8x8xf32>
    %cst_15 = arith.constant dense<0xFF800000> : vector<2x8xf32>
    %32 = vector.multi_reduction <maximumf>, %31, %cst_15 [2] : vector<2x8x8xf32> to vector<2x8xf32>
    %33 = vector.shape_cast %32 : vector<2x8xf32> to vector<2x8x1xf32>
    %34 = vector.broadcast %33 : vector<2x8x1xf32> to vector<2x8x8xf32>
    %35 = arith.subf %31, %34 : vector<2x8x8xf32>
    %36 = math.exp %35 : vector<2x8x8xf32>
    %cst_16 = arith.constant dense<0.000000e+00> : vector<2x8xf32>
    %37 = vector.multi_reduction <add>, %36, %cst_16 [2] : vector<2x8x8xf32> to vector<2x8xf32>
    %38 = vector.shape_cast %37 : vector<2x8xf32> to vector<2x8x1xf32>
    %cst_17 = arith.constant 1.000000e+00 : f32
    %39 = vector.broadcast %cst_17 : f32 to vector<2x8x1xf32>
    %40 = arith.divf %39, %38 : vector<2x8x1xf32>
    %41 = vector.broadcast %40 : vector<2x8x1xf32> to vector<2x8x8xf32>
    %42 = arith.mulf %36, %41 : vector<2x8x8xf32>
    %43 = arith.addf %26, %42 : vector<2x8x8xf32>
    %44 = vector.extract_strided_slice %7 {offsets = [0, 0, 16], sizes = [2, 8, 8], strides = [1, 1, 1]} : vector<2x8x128xf32> to vector<2x8x8xf32>
    %45 = vector.extract_strided_slice %7 {offsets = [0, 0, 48], sizes = [2, 8, 8], strides = [1, 1, 1]} : vector<2x8x128xf32> to vector<2x8x8xf32>
    %cst_18 = arith.constant dense<0.000000e+00> : vector<2x8x8xf32>
    %46 = tpu.matmul %44, %45, %cst_18 {dimension_numbers = #tpu.dot_dimension_numbers<[2], [2], [1], [1], [0, 0, 0, 1, 1, 1], [0], [0]>} : vector<2x8x8xf32>, vector<2x8x8xf32>, vector<2x8x8xf32> -> vector<2x8x8xf32>
    %47 = vector.broadcast %10 : vector<2x1x8xf32> to vector<2x8x8xf32>
    %48 = arith.addf %46, %47 : vector<2x8x8xf32>
    %cst_19 = arith.constant dense<0xFF800000> : vector<2x8xf32>
    %49 = vector.multi_reduction <maximumf>, %48, %cst_19 [2] : vector<2x8x8xf32> to vector<2x8xf32>
    %50 = vector.shape_cast %49 : vector<2x8xf32> to vector<2x8x1xf32>
    %51 = vector.broadcast %50 : vector<2x8x1xf32> to vector<2x8x8xf32>
    %52 = arith.subf %48, %51 : vector<2x8x8xf32>
    %53 = math.exp %52 : vector<2x8x8xf32>
    %cst_20 = arith.constant dense<0.000000e+00> : vector<2x8xf32>
    %54 = vector.multi_reduction <add>, %53, %cst_20 [2] : vector<2x8x8xf32> to vector<2x8xf32>
    %55 = vector.shape_cast %54 : vector<2x8xf32> to vector<2x8x1xf32>
    %cst_21 = arith.constant 1.000000e+00 : f32
    %56 = vector.broadcast %cst_21 : f32 to vector<2x8x1xf32>
    %57 = arith.divf %56, %55 : vector<2x8x1xf32>
    %58 = vector.broadcast %57 : vector<2x8x1xf32> to vector<2x8x8xf32>
    %59 = arith.mulf %53, %58 : vector<2x8x8xf32>
    %60 = arith.addf %43, %59 : vector<2x8x8xf32>
    %61 = vector.extract_strided_slice %7 {offsets = [0, 0, 24], sizes = [2, 8, 8], strides = [1, 1, 1]} : vector<2x8x128xf32> to vector<2x8x8xf32>
    %62 = vector.extract_strided_slice %7 {offsets = [0, 0, 56], sizes = [2, 8, 8], strides = [1, 1, 1]} : vector<2x8x128xf32> to vector<2x8x8xf32>
    %cst_22 = arith.constant dense<0.000000e+00> : vector<2x8x8xf32>
    %63 = tpu.matmul %61, %62, %cst_22 {dimension_numbers = #tpu.dot_dimension_numbers<[2], [2], [1], [1], [0, 0, 0, 1, 1, 1], [0], [0]>} : vector<2x8x8xf32>, vector<2x8x8xf32>, vector<2x8x8xf32> -> vector<2x8x8xf32>
    %64 = vector.broadcast %10 : vector<2x1x8xf32> to vector<2x8x8xf32>
    %65 = arith.addf %63, %64 : vector<2x8x8xf32>
    %cst_23 = arith.constant dense<0xFF800000> : vector<2x8xf32>
    %66 = vector.multi_reduction <maximumf>, %65, %cst_23 [2] : vector<2x8x8xf32> to vector<2x8xf32>
    %67 = vector.shape_cast %66 : vector<2x8xf32> to vector<2x8x1xf32>
    %68 = vector.broadcast %67 : vector<2x8x1xf32> to vector<2x8x8xf32>
    %69 = arith.subf %65, %68 : vector<2x8x8xf32>
    %70 = math.exp %69 : vector<2x8x8xf32>
    %cst_24 = arith.constant dense<0.000000e+00> : vector<2x8xf32>
    %71 = vector.multi_reduction <add>, %70, %cst_24 [2] : vector<2x8x8xf32> to vector<2x8xf32>
    %72 = vector.shape_cast %71 : vector<2x8xf32> to vector<2x8x1xf32>
    %cst_25 = arith.constant 1.000000e+00 : f32
    %73 = vector.broadcast %cst_25 : f32 to vector<2x8x1xf32>
    %74 = arith.divf %73, %72 : vector<2x8x1xf32>
    %75 = vector.broadcast %74 : vector<2x8x1xf32> to vector<2x8x8xf32>
    %76 = arith.mulf %70, %75 : vector<2x8x8xf32>
    %77 = arith.addf %60, %76 : vector<2x8x8xf32>
    %78 = vector.extract_strided_slice %7 {offsets = [0, 0, 64], sizes = [2, 8, 8], strides = [1, 1, 1]} : vector<2x8x128xf32> to vector<2x8x8xf32>
    %79 = vector.extract_strided_slice %7 {offsets = [0, 0, 96], sizes = [2, 8, 8], strides = [1, 1, 1]} : vector<2x8x128xf32> to vector<2x8x8xf32>
    %cst_26 = arith.constant dense<0.000000e+00> : vector<2x8x8xf32>
    %80 = tpu.matmul %78, %79, %cst_26 {dimension_numbers = #tpu.dot_dimension_numbers<[2], [2], [1], [1], [0, 0, 0, 1, 1, 1], [0], [0]>} : vector<2x8x8xf32>, vector<2x8x8xf32>, vector<2x8x8xf32> -> vector<2x8x8xf32>
    %81 = vector.broadcast %10 : vector<2x1x8xf32> to vector<2x8x8xf32>
    %82 = arith.addf %80, %81 : vector<2x8x8xf32>
    %cst_27 = arith.constant dense<0xFF800000> : vector<2x8xf32>
    %83 = vector.multi_reduction <maximumf>, %82, %cst_27 [2] : vector<2x8x8xf32> to vector<2x8xf32>
    %84 = vector.shape_cast %83 : vector<2x8xf32> to vector<2x8x1xf32>
    %85 = vector.broadcast %84 : vector<2x8x1xf32> to vector<2x8x8xf32>
    %86 = arith.subf %82, %85 : vector<2x8x8xf32>
    %87 = math.exp %86 : vector<2x8x8xf32>
    %cst_28 = arith.constant dense<0.000000e+00> : vector<2x8xf32>
    %88 = vector.multi_reduction <add>, %87, %cst_28 [2] : vector<2x8x8xf32> to vector<2x8xf32>
    %89 = vector.shape_cast %88 : vector<2x8xf32> to vector<2x8x1xf32>
    %cst_29 = arith.constant 1.000000e+00 : f32
    %90 = vector.broadcast %cst_29 : f32 to vector<2x8x1xf32>
    %91 = arith.divf %90, %89 : vector<2x8x1xf32>
    %92 = vector.broadcast %91 : vector<2x8x1xf32> to vector<2x8x8xf32>
    %93 = arith.mulf %87, %92 : vector<2x8x8xf32>
    %94 = arith.subf %77, %93 : vector<2x8x8xf32>
    %95 = vector.extract_strided_slice %7 {offsets = [0, 0, 72], sizes = [2, 8, 8], strides = [1, 1, 1]} : vector<2x8x128xf32> to vector<2x8x8xf32>
    %96 = vector.extract_strided_slice %7 {offsets = [0, 0, 104], sizes = [2, 8, 8], strides = [1, 1, 1]} : vector<2x8x128xf32> to vector<2x8x8xf32>
    %cst_30 = arith.constant dense<0.000000e+00> : vector<2x8x8xf32>
    %97 = tpu.matmul %95, %96, %cst_30 {dimension_numbers = #tpu.dot_dimension_numbers<[2], [2], [1], [1], [0, 0, 0, 1, 1, 1], [0], [0]>} : vector<2x8x8xf32>, vector<2x8x8xf32>, vector<2x8x8xf32> -> vector<2x8x8xf32>
    %98 = vector.broadcast %10 : vector<2x1x8xf32> to vector<2x8x8xf32>
    %99 = arith.addf %97, %98 : vector<2x8x8xf32>
    %cst_31 = arith.constant dense<0xFF800000> : vector<2x8xf32>
    %100 = vector.multi_reduction <maximumf>, %99, %cst_31 [2] : vector<2x8x8xf32> to vector<2x8xf32>
    %101 = vector.shape_cast %100 : vector<2x8xf32> to vector<2x8x1xf32>
    %102 = vector.broadcast %101 : vector<2x8x1xf32> to vector<2x8x8xf32>
    %103 = arith.subf %99, %102 : vector<2x8x8xf32>
    %104 = math.exp %103 : vector<2x8x8xf32>
    %cst_32 = arith.constant dense<0.000000e+00> : vector<2x8xf32>
    %105 = vector.multi_reduction <add>, %104, %cst_32 [2] : vector<2x8x8xf32> to vector<2x8xf32>
    %106 = vector.shape_cast %105 : vector<2x8xf32> to vector<2x8x1xf32>
    %cst_33 = arith.constant 1.000000e+00 : f32
    %107 = vector.broadcast %cst_33 : f32 to vector<2x8x1xf32>
    %108 = arith.divf %107, %106 : vector<2x8x1xf32>
    %109 = vector.broadcast %108 : vector<2x8x1xf32> to vector<2x8x8xf32>
    %110 = arith.mulf %104, %109 : vector<2x8x8xf32>
    %111 = arith.subf %94, %110 : vector<2x8x8xf32>
    %112 = vector.extract_strided_slice %7 {offsets = [0, 0, 80], sizes = [2, 8, 8], strides = [1, 1, 1]} : vector<2x8x128xf32> to vector<2x8x8xf32>
    %113 = vector.extract_strided_slice %7 {offsets = [0, 0, 112], sizes = [2, 8, 8], strides = [1, 1, 1]} : vector<2x8x128xf32> to vector<2x8x8xf32>
    %cst_34 = arith.constant dense<0.000000e+00> : vector<2x8x8xf32>
    %114 = tpu.matmul %112, %113, %cst_34 {dimension_numbers = #tpu.dot_dimension_numbers<[2], [2], [1], [1], [0, 0, 0, 1, 1, 1], [0], [0]>} : vector<2x8x8xf32>, vector<2x8x8xf32>, vector<2x8x8xf32> -> vector<2x8x8xf32>
    %115 = vector.broadcast %10 : vector<2x1x8xf32> to vector<2x8x8xf32>
    %116 = arith.addf %114, %115 : vector<2x8x8xf32>
    %cst_35 = arith.constant dense<0xFF800000> : vector<2x8xf32>
    %117 = vector.multi_reduction <maximumf>, %116, %cst_35 [2] : vector<2x8x8xf32> to vector<2x8xf32>
    %118 = vector.shape_cast %117 : vector<2x8xf32> to vector<2x8x1xf32>
    %119 = vector.broadcast %118 : vector<2x8x1xf32> to vector<2x8x8xf32>
    %120 = arith.subf %116, %119 : vector<2x8x8xf32>
    %121 = math.exp %120 : vector<2x8x8xf32>
    %cst_36 = arith.constant dense<0.000000e+00> : vector<2x8xf32>
    %122 = vector.multi_reduction <add>, %121, %cst_36 [2] : vector<2x8x8xf32> to vector<2x8xf32>
    %123 = vector.shape_cast %122 : vector<2x8xf32> to vector<2x8x1xf32>
    %cst_37 = arith.constant 1.000000e+00 : f32
    %124 = vector.broadcast %cst_37 : f32 to vector<2x8x1xf32>
    %125 = arith.divf %124, %123 : vector<2x8x1xf32>
    %126 = vector.broadcast %125 : vector<2x8x1xf32> to vector<2x8x8xf32>
    %127 = arith.mulf %121, %126 : vector<2x8x8xf32>
    %128 = arith.subf %111, %127 : vector<2x8x8xf32>
    %129 = vector.extract_strided_slice %7 {offsets = [0, 0, 88], sizes = [2, 8, 8], strides = [1, 1, 1]} : vector<2x8x128xf32> to vector<2x8x8xf32>
    %130 = vector.extract_strided_slice %7 {offsets = [0, 0, 120], sizes = [2, 8, 8], strides = [1, 1, 1]} : vector<2x8x128xf32> to vector<2x8x8xf32>
    %cst_38 = arith.constant dense<0.000000e+00> : vector<2x8x8xf32>
    %131 = tpu.matmul %129, %130, %cst_38 {dimension_numbers = #tpu.dot_dimension_numbers<[2], [2], [1], [1], [0, 0, 0, 1, 1, 1], [0], [0]>} : vector<2x8x8xf32>, vector<2x8x8xf32>, vector<2x8x8xf32> -> vector<2x8x8xf32>
    %132 = vector.broadcast %10 : vector<2x1x8xf32> to vector<2x8x8xf32>
    %133 = arith.addf %131, %132 : vector<2x8x8xf32>
    %cst_39 = arith.constant dense<0xFF800000> : vector<2x8xf32>
    %134 = vector.multi_reduction <maximumf>, %133, %cst_39 [2] : vector<2x8x8xf32> to vector<2x8xf32>
    %135 = vector.shape_cast %134 : vector<2x8xf32> to vector<2x8x1xf32>
    %136 = vector.broadcast %135 : vector<2x8x1xf32> to vector<2x8x8xf32>
    %137 = arith.subf %133, %136 : vector<2x8x8xf32>
    %138 = math.exp %137 : vector<2x8x8xf32>
    %cst_40 = arith.constant dense<0.000000e+00> : vector<2x8xf32>
    %139 = vector.multi_reduction <add>, %138, %cst_40 [2] : vector<2x8x8xf32> to vector<2x8xf32>
    %140 = vector.shape_cast %139 : vector<2x8xf32> to vector<2x8x1xf32>
    %cst_41 = arith.constant 1.000000e+00 : f32
    %141 = vector.broadcast %cst_41 : f32 to vector<2x8x1xf32>
    %142 = arith.divf %141, %140 : vector<2x8x1xf32>
    %143 = vector.broadcast %142 : vector<2x8x1xf32> to vector<2x8x8xf32>
    %144 = arith.mulf %138, %143 : vector<2x8x8xf32>
    %145 = arith.subf %128, %144 : vector<2x8x8xf32>
    %cst_42 = arith.constant 1.000000e+00 : f32
    %146 = vector.broadcast %cst_42 : f32 to vector<2x1x8xf32>
    %147 = arith.subf %146, %8 : vector<2x1x8xf32>
    %c0_43 = arith.constant 0 : index
    %c0_44 = arith.constant 0 : index
    %c0_45 = arith.constant 0 : index
    %148 = vector.load %arg3[%c0_43, %c0_44, %c0_45] : memref<2x8x1xf32, #tpu.memory_space<vmem>>, vector<2x8x1xf32>
    %cst_46 = arith.constant 1.000000e+00 : f32
    %149 = vector.broadcast %cst_46 : f32 to vector<2x8x1xf32>
    %150 = arith.subf %149, %148 : vector<2x8x1xf32>
    %c0_47 = arith.constant 0 : index
    %c0_48 = arith.constant 0 : index
    %c0_49 = arith.constant 0 : index
    %151 = vector.load %arg4[%c0_47, %c0_48, %c0_49] : memref<2x8x8xf32, #tpu.memory_space<vmem>>, vector<2x8x8xf32>
    %152 = arith.addf %151, %145 : vector<2x8x8xf32>
    %153 = vector.broadcast %147 : vector<2x1x8xf32> to vector<2x8x8xf32>
    %154 = arith.mulf %152, %153 : vector<2x8x8xf32>
    %155 = vector.broadcast %150 : vector<2x8x1xf32> to vector<2x8x8xf32>
    %156 = arith.mulf %154, %155 : vector<2x8x8xf32>
    %c0_50 = arith.constant 0 : index
    %c0_51 = arith.constant 0 : index
    %c0_52 = arith.constant 0 : index
    %157 = vector.load %arg7[%c0_50, %c0_51, %c0_52] : memref<2x8x8xf32, #tpu.memory_space<vmem>>, vector<2x8x8xf32>
    tpu.vector_store %arg7[%c0_50, %c0_51, %c0_52], %156 {strides = array<i32>} : memref<2x8x8xf32, #tpu.memory_space<vmem>>, vector<2x8x8xf32>,
    return
  }
  func.func @transform_0(%arg0: i32) -> (i32, i32, i32) {
    %c0_i32 = arith.constant 0 : i32
    %c0_i32_0 = arith.constant 0 : i32
    %c0_i32_1 = arith.constant 0 : i32
    return %arg0, %c0_i32, %c0_i32_0 : i32, i32, i32
  }
  func.func @transform_1(%arg0: i32) -> (i32, i32, i32) {
    %c0_i32 = arith.constant 0 : i32
    %c0_i32_0 = arith.constant 0 : i32
    %c0_i32_1 = arith.constant 0 : i32
    return %arg0, %c0_i32, %c0_i32_0 : i32, i32, i32
  }
  func.func @transform_2(%arg0: i32) -> (i32, i32, i32) {
    %c0_i32 = arith.constant 0 : i32
    %c0_i32_0 = arith.constant 0 : i32
    %c0_i32_1 = arith.constant 0 : i32
    return %arg0, %c0_i32, %c0_i32_0 : i32, i32, i32
  }
  func.func @transform_3(%arg0: i32) -> (i32, i32, i32) {
    %c0_i32 = arith.constant 0 : i32
    %c0_i32_0 = arith.constant 0 : i32
    %c0_i32_1 = arith.constant 0 : i32
    return %arg0, %c0_i32, %c0_i32_0 : i32, i32, i32
  }
  func.func @transform_4(%arg0: i32) -> (i32, i32) {
    %c0_i32 = arith.constant 0 : i32
    %c0_i32_0 = arith.constant 0 : i32
    %c0_i32_1 = arith.constant 0 : i32
    return %c0_i32, %c0_i32_0 : i32, i32
  }
  func.func @transform_5(%arg0: i32) -> (i32, i32) {
    %c0_i32 = arith.constant 0 : i32
    %c0_i32_0 = arith.constant 0 : i32
    %c0_i32_1 = arith.constant 0 : i32
    return %c0_i32, %c0_i32_0 : i32, i32
  }
  func.func @transform_6(%arg0: i32) -> (i32, i32, i32) {
    %c0_i32 = arith.constant 0 : i32
    %c0_i32_0 = arith.constant 0 : i32
    %c0_i32_1 = arith.constant 0 : i32
    return %arg0, %c0_i32, %c0_i32_0 : i32, i32, i32
  }
}

</mosaic_0001>

<bundles_post_ra>
// kernel: tpu_custom_call.1
= control target key start
LH: loop header
LB: loop body
LE: loop exit
PB: predicated region body
PF: predicated region fallthrough
CT: control target
= control target key end

     0   :  { %11 = vsyncpa [#allocation3], 0  ;;  %s1881_s0 = inlined_call_operand.vmem [shape: f32[2,8,32], index: 0, kind: input, shape index: {}]   ;;  %s1882_s1 = inlined_call_operand.vmem [shape: f32[2,1,8], index: 1, kind: input, shape index: {}]   ;;  %s1883_s2 = inlined_call_operand.vmem [shape: f32[2,8,1], index: 2, kind: input, shape index: {}]   ;;  %s1884_s3 = inlined_call_operand.hbm [shape: f32[2,8,8], index: 3, kind: input, shape index: {}]   ;;  %s1885_s4 = inlined_call_operand.hbm [shape: f32[32,128], index: 4, kind: input, shape index: {}]   ;;  %s1886_s5 = inlined_call_operand.vmem [shape: f32[1,128], index: 5, kind: input, shape index: {}]   ;;  %s1887_s6 = inlined_call_operand.hbm [shape: f32[2,8,8], index: 6, kind: output, shape index: {}]  }
   0x1   :  { %12 = vsyncpa [#allocation6], 0 }
   0x2   :  { %13 = vsyncpa [#allocation4], 0  ;;  %s24_s23 = sshll.u32 %s1884_s3, 4  ;;  %s1219_s24 = smov [#allocation2]   ;;  %s25_s23 = int_to_ptr.hbm [resolvable:$true] %s24_s23 }
   0x3   :  { %s26_s25 = sshll.u32 %s1219_s24, 4  ;;  %s37_s28 = sshll.u32 %s1885_s4, 4  ;;  %s27_s25 = int_to_ptr.vmem [resolvable:$true] %s26_s25  ;;  %s38_s28 = int_to_ptr.hbm [resolvable:$true] %s37_s28 }
   0x4   :  { %s1220_s29 = smov 128   ;;  %s1221_s30 = smov 8  }
   0x5   :  { %32 = dma.hbm_to_vmem [thread:$0]  %s25_s23, 256, %s27_s25, [#allocation3], %s1220_s29, %s1220_s29, %s1221_s30  }
   0x6   :  { %s1222_s7 = smov [#allocation5]  }
   0x7   :  { %s39_s8 = sshll.u32 %s1222_s7, 4  ;;  %s40_s8 = int_to_ptr.vmem [resolvable:$true] %s39_s8 }
   0x8   :  { %45 = dma.hbm_to_vmem [thread:$0]  %s38_s28, 512, %s40_s8, [#allocation6], %s1220_s29, %s1220_s29, %s1221_s30  }
   0x9   :  { %1213 = dma.done.wait [#allocation3], 256  }
   0xa   :  { %1214 = vsyncadd [#allocation3], 4294967040 }
   0xb   :  { %1215 = dma.done.wait [#allocation6], 512  }
   0xc   :  { %1216 = vsyncadd [#allocation6], 4294966784  ;;  %v61_v0 = vld [vmem:[#allocation5 + $0x18] sm:$0xff]  ;;  %v60_v1 = vld [vmem:[#allocation5 + $0x10] sm:$0xff]  ;;  %vm66_vm0 = vcmask 261120   ;;  %s1223_s13 = smov 120  }
   0xd   :  { %85 = vmatpush.msra.mxu0 %v61_v0  ;;  %v59_v2 = vld [vmem:[#allocation5 + $0x8] sm:$0xff]  ;;  %v58_v3 = vld [vmem:[#allocation5] sm:$0xff]  ;;  %v56_v4 = vld [vmem:[%s1881_s0] sm:$0xff]  ;;  %s1224_s14 = smov 88   ;;  %s1225_s15 = smov 96   ;;  %vm109_vm1 = vcmask 64512  }
   0xe   :  { %v57_v5 = vld [vmem:[%s1881_s0 + $0x8] sm:$0xff]  ;;  %v1076_v6 = vld [vmem:[%s1886_s5] ss:$0 sm:$0xff]  ;;  %s1226_s16 = smov 112   ;;  %s1227_s17 = smov 80  }
   0xf   :  { %86 = vmatpush.msra.mxu0 %v60_v1  ;;  %s1228_s0 = smov 72   ;;  %s1229_s18 = smov 16   ;;  %v1336_v41 = vld [vmem:[%s1882_s1] sm:$0x1]  ;;  %v1354_v50 = vld [vmem:[%s1882_s1 + $0x1] sm:$0x1] }
  0x10   :  { %s1230_s19 = smov 32   ;;  %s1231_s5 = smov 104   ;;  %v98_v42 = vmul.f32 -1e+30, %v1336_v41  ;;  %v99_v51 = vmul.f32 -1e+30, %v1354_v50 }
  0x11   :  { %87 = vmatpush.msra.mxu0 %v59_v2  ;;  %s1232_s20 = smov 56   ;;  %s1233_s21 = smov 64  }
  0x12   :  { %s1234_s22 = smov 48   ;;  %s1235_s23 = smov 24   ;;  %v1339_v43 = vperm.slane %v98_v42, 0  ;;  %v103_v53 = vperm.slane %v99_v51, 0 }
  0x13   :  { %88 = vmatpush.msra.mxu0 %v58_v3  ;;  %s1236_s24 = smov 40   ;;  %s1005_s11 = sshll.u32 %s1887_s6, 4  ;;  %s1006_s11 = int_to_ptr.hbm [resolvable:$true] %s1005_s11 }
  0x14   :  { %1019 = vmatmul.msk.f32.vlgmr.msra.gmra.mxu0 %vm66_vm0, %v56_v4 }
  0x1c   :  { %1020 = vmatmul.msk.f32.gmra.mxu0 %vm66_vm0, %v57_v5 }
  0x91   :  { %v90_v7 = vpop.f32.mrf.mxu0 }
  0x92   :  { %v91_v8 = vadd.f32 %v1076_v6, %v90_v7 }
  0x94   :  { %211 = vrot.lane.b32.xlu2 %v91_v8, %s1223_s13  ;;  %213 = vrot.lane.b32.xlu1 %v91_v8, %s1224_s14 }
  0x95   :  { %107 = vrot.lane.b32.xlu0 %v91_v8, %s1225_s15 }
  0x99   :  { %v93_v9 = vpop.f32.mrf.mxu0 }
  0x9a   :  { %v94_v10 = vadd.f32 %v1076_v6, %v93_v9 }
  0x9c   :  { %319 = vrot.lane.b32.xlu2 %v91_v8, %s1226_s16  ;;  %321 = vrot.lane.b32.xlu1 %v91_v8, %s1227_s17 }
  0x9d   :  { %429 = vrot.lane.b32.xlu0 %v91_v8, %s1228_s0 }
  0xa4   :  { %753 = vrot.lane.b32.xlu2 %v91_v8, %s1229_s18  ;;  %537 = vrot.lane.b32.xlu1 %v91_v8, %s1230_s19 }
  0xa5   :  { %427 = vrot.lane.b32.xlu0 %v91_v8, %s1231_s5 }
  0xac   :  { %643 = vrot.lane.b32.xlu2 %v91_v8, %s1232_s20  ;;  %535 = vrot.lane.b32.xlu1 %v91_v8, %s1233_s21 }
  0xad   :  { %751 = vrot.lane.b32.xlu0 %v91_v8, %s1234_s22 }
  0xb4   :  { %457 = vrot.lane.b32.xlu2 %v94_v10, %s1228_s0  ;;  %645 = vrot.lane.b32.xlu1 %v91_v8, %s1235_s23 }
  0xb5   :  { %135 = vrot.lane.b32.xlu0 %v94_v10, %s1225_s15 }
  0xbc   :  { %455 = vrot.lane.b32.xlu2 %v94_v10, %s1231_s5  ;;  %349 = vrot.lane.b32.xlu1 %v94_v10, %s1227_s17 }
  0xbd   :  { %241 = vrot.lane.b32.xlu0 %v94_v10, %s1224_s14 }
  0xc4   :  { %673 = vrot.lane.b32.xlu2 %v94_v10, %s1235_s23  ;;  %347 = vrot.lane.b32.xlu1 %v94_v10, %s1226_s16 }
  0xc5   :  { %239 = vrot.lane.b32.xlu0 %v94_v10, %s1223_s13 }
  0xcc   :  { %671 = vrot.lane.b32.xlu2 %v94_v10, %s1232_s20  ;;  %889 = vrot.lane.b32.xlu1 %v94_v10, %s1221_s30 }
  0xcd   :  { %565 = vrot.lane.b32.xlu0 %v94_v10, %s1230_s19 }
  0xd4   :  { %781 = vrot.lane.b32.xlu2 %v94_v10, %s1229_s18  ;;  %887 = vrot.lane.b32.xlu1 %v94_v10, %s1236_s24 }
  0xd5   :  { %563 = vrot.lane.b32.xlu0 %v94_v10, %s1233_s21 }
  0xdc   :  { %859 = vrot.lane.b32.xlu2 %v91_v8, %s1236_s24  ;;  %779 = vrot.lane.b32.xlu1 %v94_v10, %s1234_s22 }
  0xdd   :  { %861 = vrot.lane.b32.xlu0 %v91_v8, %s1221_s30 }
  0xee   :  { %v212_v11 = vpop.permute.xlu2 %211 }
  0xf6   :  { %v320_v12 = vpop.permute.xlu2 %319 }
  0xfe   :  { %v754_v13 = vpop.permute.xlu2 %753 }
 0x106   :  { %v214_v14 = vpop.permute.xlu1 %213  ;;  %v644_v16 = vpop.permute.xlu2 %643 }
 0x107   :  { %v108_v15 = vpop.permute.xlu0 %107  ;;  %1025 = vmatpush.xpose.msk.msra.mxu3 %vm109_vm1, %v214_v14 }
 0x108   :  { %1021 = vmatpush.xpose.msk.msra.mxu1 %vm109_vm1, %v108_v15 }
 0x10a   :  { %1026 = vmatmul.msk.f32.vlgmr.msra.gmra.mxu3 %vm109_vm1, %v212_v11 }
 0x10b   :  { %1022 = vmatmul.msk.f32.vlgmr.msra.gmra.mxu1 %vm109_vm1, %v91_v8 }
 0x10e   :  { %v322_v17 = vpop.permute.xlu1 %321  ;;  %v458_v21 = vpop.permute.xlu2 %457 }
 0x10f   :  { %v430_v18 = vpop.permute.xlu0 %429 }
 0x116   :  { %v538_v19 = vpop.permute.xlu1 %537  ;;  %v456_v24 = vpop.permute.xlu2 %455 }
 0x117   :  { %v428_v20 = vpop.permute.xlu0 %427 }
 0x11e   :  { %v536_v22 = vpop.permute.xlu1 %535  ;;  %v674_v27 = vpop.permute.xlu2 %673 }
 0x11f   :  { %v752_v23 = vpop.permute.xlu0 %751 }
 0x126   :  { %v646_v25 = vpop.permute.xlu1 %645  ;;  %v672_v30 = vpop.permute.xlu2 %671 }
 0x127   :  { %v136_v26 = vpop.permute.xlu0 %135 }
 0x128   :  { %1023 = vmatpush.xpose.msk.msra.mxu2 %vm109_vm1, %v136_v26 }
 0x12b   :  { %1024 = vmatmul.msk.f32.vlgmr.msra.gmra.mxu2 %vm109_vm1, %v94_v10 }
 0x12c   :  { %1029 = vmatpush.xpose.msk.msrb.mxu2 %vm109_vm1, %v322_v17 }
 0x12e   :  { %v350_v28 = vpop.permute.xlu1 %349  ;;  %v782_v35 = vpop.permute.xlu2 %781 }
 0x12f   :  { %v242_v29 = vpop.permute.xlu0 %241  ;;  %1031 = vmatpush.xpose.msk.msrb.mxu3 %vm109_vm1, %v350_v28 }
 0x130   :  { %1035 = vmatpush.xpose.msk.msra.mxu2 %vm109_vm1, %v458_v21  ;;  %1027 = vmatpush.xpose.msk.msrb.mxu1 %vm109_vm1, %v242_v29 }
 0x133   :  { %1037 = vmatpush.xpose.msk.msra.mxu3 %vm109_vm1, %v538_v19  ;;  %1030 = vmatmul.msk.f32.vlgmr.msrb.gmra.mxu2 %vm109_vm1, %v320_v12 }
 0x134   :  { %1033 = vmatpush.xpose.msk.msra.mxu1 %vm109_vm1, %v430_v18  ;;  %1043 = vmatpush.xpose.msk.msrb.mxu2 %vm109_vm1, %v674_v27 }
 0x136   :  { %v348_v31 = vpop.permute.xlu1 %347  ;;  %v860_v40 = vpop.permute.xlu2 %859 }
 0x137   :  { %v240_v32 = vpop.permute.xlu0 %239  ;;  %1032 = vmatmul.msk.f32.vlgmr.msrb.gmra.mxu3 %vm109_vm1, %v348_v31 }
 0x138   :  { %1028 = vmatmul.msk.f32.vlgmr.msrb.gmra.mxu1 %vm109_vm1, %v240_v32  ;;  %1045 = vmatpush.xpose.msk.msrb.mxu3 %vm109_vm1, %v754_v13 }
 0x139   :  { %1041 = vmatpush.xpose.msk.msrb.mxu1 %vm109_vm1, %v646_v25 }
 0x13b   :  { %1036 = vmatmul.msk.f32.vlgmr.msra.gmra.mxu2 %vm109_vm1, %v456_v24 }
 0x13e   :  { %v890_v33 = vpop.permute.xlu1 %889 }
 0x13f   :  { %v566_v34 = vpop.permute.xlu0 %565  ;;  %1038 = vmatmul.msk.f32.vlgmr.msra.gmra.mxu3 %vm109_vm1, %v536_v22  ;;  %1051 = vmatpush.xpose.msk.msra.mxu2 %vm109_vm1, %v890_v33 }
 0x140   :  { %1034 = vmatmul.msk.f32.vlgmr.msra.gmra.mxu1 %vm109_vm1, %v428_v20  ;;  %1039 = vmatpush.xpose.msk.msrb.mxu0 %vm109_vm1, %v566_v34 }
 0x143   :  { %1044 = vmatmul.msk.f32.vlgmr.msrb.gmra.mxu2 %vm109_vm1, %v672_v30 }
 0x144   :  { %1047 = vmatpush.xpose.msk.msra.mxu0 %vm109_vm1, %v782_v35 }
 0x146   :  { %v888_v36 = vpop.permute.xlu1 %887 }
 0x147   :  { %v564_v37 = vpop.permute.xlu0 %563  ;;  %1046 = vmatmul.msk.f32.vlgmr.msrb.gmra.mxu3 %vm109_vm1, %v752_v23 }
 0x148   :  { %1040 = vmatmul.msk.f32.vlgmr.msrb.gmra.mxu0 %vm109_vm1, %v564_v37  ;;  %1042 = vmatmul.msk.f32.vlgmr.msrb.gmra.mxu1 %vm109_vm1, %v644_v16 }
 0x14b   :  { %1052 = vmatmul.msk.f32.vlgmr.msra.gmra.mxu2 %vm109_vm1, %v888_v36 }
 0x14e   :  { %v780_v38 = vpop.permute.xlu1 %779 }
 0x14f   :  { %v862_v39 = vpop.permute.xlu0 %861 }
 0x150   :  { %1048 = vmatmul.msk.f32.vlgmr.msra.gmra.mxu0 %vm109_vm1, %v780_v38  ;;  %1049 = vmatpush.xpose.msk.msra.mxu1 %vm109_vm1, %v862_v39 }
 0x153   :  { %1050 = vmatmul.msk.f32.vlgmr.msra.gmra.mxu1 %vm109_vm1, %v860_v40 }
 0x188   :  { %v131_v44 = vpop.f32.mrf.mxu1 }
 0x189   :  { %v1342_v45 = vadd.f32 %v131_v44, %v1339_v43 }
 0x18b   :  { %v161_v46 = vsel %vm109_vm1, %v1342_v45, -inf }
 0x18c   :  { %162 = vmax.xlane.f32.xlu0 %v161_v46 }
 0x18d   :  { %v236_v47 = vpop.f32.mrf.mxu3 }
 0x18e   :  { %v1347_v48 = vadd.f32 %v236_v47, %v1339_v43 }
 0x190   :  { %v267_v49 = vsel %vm109_vm1, %v1347_v48, -inf }
 0x194   :  { %268 = vmax.xlane.f32.xlu0 %v267_v49 }
 0x1ae   :  { %v158_v52 = vpop.f32.mrf.mxu2 }
 0x1af   :  { %v1377_v7 = vadd.f32 %v158_v52, %v103_v53 }
 0x1b1   :  { %v164_v13 = vsel %vm109_vm1, %v1377_v7, -inf }
 0x1b5   :  { %v264_v54 = vpop.f32.mrf.mxu1 }
 0x1b6   :  { %v1357_v55 = vadd.f32 %v264_v54, %v103_v53  ;;  %v344_v57 = vpop.f32.mrf.mxu2 }
 0x1b7   :  { %v1390_v15 = vadd.f32 %v344_v57, %v1339_v43 }
 0x1b8   :  { %v270_v56 = vsel %vm109_vm1, %v1357_v55, -inf }
 0x1b9   :  { %271 = vmax.xlane.f32.xlu1 %v270_v56  ;;  %v375_v19 = vsel %vm109_vm1, %v1390_v15, -inf }
 0x1ba   :  { %v372_v58 = vpop.f32.mrf.mxu3 }
 0x1bb   :  { %v1361_v59 = vadd.f32 %v372_v58, %v103_v53 }
 0x1bd   :  { %v378_v60 = vsel %vm109_vm1, %v1361_v59, -inf  ;;  %v452_v61 = vpop.f32.mrf.mxu1 }
 0x1be   :  { %379 = vmax.xlane.f32.xlu2 %v378_v60  ;;  %v1366_v62 = vadd.f32 %v452_v61, %v1339_v43  ;;  %v480_v0 = vpop.f32.mrf.mxu2 }
 0x1bf   :  { %v1401_v21 = vadd.f32 %v480_v0, %v103_v53 }
 0x1c0   :  { %v483_v2 = vsel %vm109_vm1, %v1366_v62, -inf }
 0x1c1   :  { %v486_v23 = vsel %vm109_vm1, %v1401_v21, -inf }
 0x1c2   :  { %v560_v63 = vpop.f32.mrf.mxu3 }
 0x1c3   :  { %v1393_v16 = vadd.f32 %v560_v63, %v1339_v43 }
 0x1c5   :  { %v588_v1 = vpop.f32.mrf.mxu0  ;;  %v591_v18 = vsel %vm109_vm1, %v1393_v16, -inf  ;;  %v668_v20 = vpop.f32.mrf.mxu1 }
 0x1c6   :  { %v1370_v3 = vadd.f32 %v588_v1, %v103_v53  ;;  %484 = vmax.xlane.f32.xlu2 %v483_v2  ;;  %v696_v10 = vpop.f32.mrf.mxu2  ;;  %v1404_v22 = vadd.f32 %v668_v20, %v1339_v43 }
 0x1c7   :  { %v1387_v14 = vadd.f32 %v696_v10, %v103_v53 }
 0x1c8   :  { %v594_v4 = vsel %vm109_vm1, %v1370_v3, -inf  ;;  %v699_v24 = vsel %vm109_vm1, %v1404_v22, -inf }
 0x1c9   :  { %595 = vmax.xlane.f32.xlu1 %v594_v4  ;;  %v702_v17 = vsel %vm109_vm1, %v1387_v14, -inf }
 0x1ca   :  { %v776_v5 = vpop.f32.mrf.mxu3 }
 0x1cb   :  { %v1375_v6 = vadd.f32 %v776_v5, %v1339_v43 }
 0x1cd   :  { %v804_v8 = vpop.f32.mrf.mxu0  ;;  %v807_v9 = vsel %vm109_vm1, %v1375_v6, -inf }
 0x1ce   :  { %v1381_v11 = vadd.f32 %v804_v8, %v103_v53  ;;  %808 = vmax.xlane.f32.xlu2 %v807_v9  ;;  %v912_v25 = vpop.f32.mrf.mxu2 }
 0x1cf   :  { %v1410_v27 = vadd.f32 %v912_v25, %v103_v53 }
 0x1d0   :  { %v810_v12 = vsel %vm109_vm1, %v1381_v11, -inf  ;;  %v884_v26 = vpop.f32.mrf.mxu1 }
 0x1d1   :  { %811 = vmax.xlane.f32.xlu0 %v810_v12  ;;  %165 = vmax.xlane.f32.xlu1 %v164_v13  ;;  %v1413_v28 = vadd.f32 %v884_v26, %v1339_v43  ;;  %v918_v29 = vsel %vm109_vm1, %v1410_v27, -inf }
 0x1d3   :  { %v915_v30 = vsel %vm109_vm1, %v1413_v28, -inf }
 0x1d6   :  { %703 = vmax.xlane.f32.xlu2 %v702_v17 }
 0x1d9   :  { %592 = vmax.xlane.f32.xlu0 %v591_v18  ;;  %376 = vmax.xlane.f32.xlu1 %v375_v19 }
 0x1e1   :  { %487 = vmax.xlane.f32.xlu0 %v486_v23  ;;  %700 = vmax.xlane.f32.xlu1 %v699_v24 }
 0x1e9   :  { %919 = vmax.xlane.f32.xlu1 %v918_v29  ;;  %916 = vmax.xlane.f32.xlu0 %v915_v30 }
 0x1ff   :  { %v163_v31 = vpop.xlane.xlu0 %162 }
 0x200   :  { %v167_v32 = vsub.f32 %v1342_v45, %v163_v31 }
 0x202   :  { %v169_v33 = vmul.f32 1.442695, %v167_v32 }
 0x204   :  { %1077 = vpow2.f32 %v169_v33 }
 0x207   :  { %v269_v34 = vpop.xlane.xlu0 %268 }
 0x208   :  { %v273_v35 = vsub.f32 %v1347_v48, %v269_v34 }
 0x20a   :  { %v1421_v36 = vpop.eup %1077  ;;  %v275_v37 = vmul.f32 1.442695, %v273_v35 }
 0x20b   :  { %v173_v38 = vsel %vm109_vm1, %v1421_v36, 0.0 }
 0x20c   :  { %1079 = vpow2.f32 %v275_v37  ;;  %174 = vadd.xlane.f32.xlu2 %v173_v38 }
 0x212   :  { %v1425_v39 = vpop.eup %1079 }
 0x213   :  { %v279_v40 = vsel %vm109_vm1, %v1425_v39, 0.0 }
 0x214   :  { %280 = vadd.xlane.f32.xlu2 %v279_v40 }
 0x22c   :  { %v272_v42 = vpop.xlane.xlu1 %271 }
 0x22d   :  { %v274_v43 = vsub.f32 %v1357_v55, %v272_v42 }
 0x22f   :  { %v277_v44 = vmul.f32 1.442695, %v274_v43 }
 0x231   :  { %1081 = vpow2.f32 %v277_v44  ;;  %v380_v45 = vpop.xlane.xlu2 %379 }
 0x232   :  { %v382_v46 = vsub.f32 %v1361_v59, %v380_v45 }
 0x234   :  { %v385_v47 = vmul.f32 1.442695, %v382_v46 }
 0x236   :  { %1083 = vpow2.f32 %v385_v47 }
 0x237   :  { %v1431_v48 = vpop.eup %1081 }
 0x238   :  { %v282_v49 = vsel %vm109_vm1, %v1431_v48, 0.0 }
 0x239   :  { %283 = vadd.xlane.f32.xlu0 %v282_v49  ;;  %v485_v51 = vpop.xlane.xlu2 %484 }
 0x23a   :  { %v489_v52 = vsub.f32 %v1366_v62, %v485_v51 }
 0x23c   :  { %v1436_v53 = vpop.eup %1083  ;;  %v491_v54 = vmul.f32 1.442695, %v489_v52  ;;  %v596_v55 = vpop.xlane.xlu1 %595  ;;  %v969_v52 = vld [vmem:[%s1883_s2] sm:$0xff] }
 0x23d   :  { %v598_v56 = vsub.f32 %v1370_v3, %v596_v55  ;;  %v390_v57 = vsel %vm109_vm1, %v1436_v53, 0.0  ;;  %v971_v55 = vsub.f32 1.0, %v969_v52 }
 0x23e   :  { %1085 = vpow2.f32 %v491_v54  ;;  %391 = vadd.xlane.f32.xlu1 %v390_v57  ;;  %v1237_v54 = vmov 0  }
 0x23f   :  { %v601_v58 = vmul.f32 1.442695, %v598_v56  ;;  %1073 = vset.pattern.permute.xlu1 %v1237_v54  ;;  %1074 = vset.pattern.permute.xlu2 %v1237_v54 }
 0x240   :  { %1075 = vset.pattern.permute.xlu0 %v1237_v54 }
 0x241   :  { %1087 = vpow2.f32 %v601_v58  ;;  %v809_v59 = vpop.xlane.xlu2 %808  ;;  %v970_v58 = vld [vmem:[%s1883_s2 + $0x8] sm:$0xff]  ;;  %s1238_s2 = smov [#allocation7]  }
 0x242   :  { %v813_v60 = vsub.f32 %v1375_v6, %v809_v59  ;;  %v972_v59 = vsub.f32 1.0, %v970_v58  ;;  %s1003_s4 = sshll.u32 %s1238_s2, 4  ;;  %s1004_s4 = int_to_ptr.vmem [resolvable:$true] %s1003_s4 }
 0x244   :  { %v1442_v61 = vpop.eup %1085  ;;  %v815_v63 = vmul.f32 1.442695, %v813_v60  ;;  %v166_v62 = vpop.xlane.xlu1 %165 }
 0x245   :  { %v812_v0 = vpop.xlane.xlu0 %811  ;;  %v168_v1 = vsub.f32 %v1377_v7, %v166_v62  ;;  %v495_v2 = vsel %vm109_vm1, %v1442_v61, 0.0 }
 0x246   :  { %1089 = vpow2.f32 %v815_v63  ;;  %496 = vadd.xlane.f32.xlu1 %v495_v2  ;;  %v814_v5 = vsub.f32 %v1381_v11, %v812_v0 }
 0x247   :  { %v1447_v3 = vpop.eup %1087  ;;  %v171_v4 = vmul.f32 1.442695, %v168_v1 }
 0x248   :  { %v606_v6 = vsel %vm109_vm1, %v1447_v3, 0.0  ;;  %v817_v10 = vmul.f32 1.442695, %v814_v5 }
 0x249   :  { %1091 = vpow2.f32 %v171_v4  ;;  %607 = vadd.xlane.f32.xlu0 %v606_v6  ;;  %v704_v8 = vpop.xlane.xlu2 %703 }
 0x24a   :  { %v706_v9 = vsub.f32 %v1387_v14, %v704_v8 }
 0x24c   :  { %v1453_v7 = vpop.eup %1089  ;;  %v709_v12 = vmul.f32 1.442695, %v706_v9  ;;  %v377_v13 = vpop.xlane.xlu1 %376 }
 0x24d   :  { %v593_v17 = vpop.xlane.xlu0 %592  ;;  %v381_v18 = vsub.f32 %v1390_v15, %v377_v13  ;;  %v819_v19 = vsel %vm109_vm1, %v1453_v7, 0.0 }
 0x24e   :  { %1093 = vpow2.f32 %v709_v12  ;;  %820 = vadd.xlane.f32.xlu1 %v819_v19  ;;  %v597_v23 = vsub.f32 %v1393_v16, %v593_v17 }
 0x24f   :  { %v1458_v11 = vpop.eup %1091  ;;  %1095 = vpow2.f32 %v817_v10  ;;  %v383_v20 = vmul.f32 1.442695, %v381_v18 }
 0x250   :  { %v176_v14 = vsel %vm109_vm1, %v1458_v11, 0.0  ;;  %v599_v24 = vmul.f32 1.442695, %v597_v23 }
 0x251   :  { %1097 = vpow2.f32 %v383_v20  ;;  %177 = vadd.xlane.f32.xlu2 %v176_v14 }
 0x252   :  { %1099 = vpow2.f32 %v599_v24 }
 0x254   :  { %v1463_v25 = vpop.eup %1093  ;;  %v701_v15 = vpop.xlane.xlu1 %700 }
 0x255   :  { %v488_v26 = vpop.xlane.xlu0 %487  ;;  %v1465_v29 = vpop.eup %1095  ;;  %v705_v30 = vsub.f32 %v1404_v22, %v701_v15  ;;  %v714_v31 = vsel %vm109_vm1, %v1463_v25, 0.0 }
 0x256   :  { %715 = vadd.xlane.f32.xlu1 %v714_v31  ;;  %v490_v33 = vsub.f32 %v1401_v21, %v488_v26  ;;  %v822_v35 = vsel %vm109_vm1, %v1465_v29, 0.0 }
 0x257   :  { %v1470_v32 = vpop.eup %1097  ;;  %v707_v16 = vmul.f32 1.442695, %v705_v30 }
 0x258   :  { %v387_v34 = vsel %vm109_vm1, %v1470_v32, 0.0  ;;  %v493_v22 = vmul.f32 1.442695, %v490_v33  ;;  %v1477_v40 = vpop.eup %1099 }
 0x259   :  { %1101 = vpow2.f32 %v707_v16  ;;  %388 = vadd.xlane.f32.xlu0 %v387_v34  ;;  %823 = vadd.xlane.f32.xlu2 %v822_v35  ;;  %v603_v46 = vsel %vm109_vm1, %v1477_v40, 0.0 }
 0x25a   :  { %1103 = vpow2.f32 %v493_v22 }
 0x25c   :  { %v920_v37 = vpop.xlane.xlu1 %919 }
 0x25d   :  { %v917_v38 = vpop.xlane.xlu0 %916  ;;  %v922_v42 = vsub.f32 %v1410_v27, %v920_v37 }
 0x25e   :  { %v921_v44 = vsub.f32 %v1413_v28, %v917_v38 }
 0x25f   :  { %v1480_v43 = vpop.eup %1101  ;;  %v925_v21 = vmul.f32 1.442695, %v922_v42 }
 0x260   :  { %v711_v45 = vsel %vm109_vm1, %v1480_v43, 0.0  ;;  %v923_v47 = vmul.f32 1.442695, %v921_v44  ;;  %v1487_v49 = vpop.eup %1103 }
 0x261   :  { %1105 = vpow2.f32 %v925_v21  ;;  %712 = vadd.xlane.f32.xlu0 %v711_v45  ;;  %604 = vadd.xlane.f32.xlu2 %v603_v46  ;;  %v498_v28 = vsel %vm109_vm1, %v1487_v49, 0.0 }
 0x262   :  { %1107 = vpow2.f32 %v923_v47 }
 0x267   :  { %v1489_v51 = vpop.eup %1105 }
 0x268   :  { %v930_v27 = vsel %vm109_vm1, %v1489_v51, 0.0  ;;  %v1498_v56 = vpop.eup %1107 }
 0x269   :  { %931 = vadd.xlane.f32.xlu0 %v930_v27  ;;  %499 = vadd.xlane.f32.xlu2 %v498_v28  ;;  %v927_v57 = vsel %vm109_vm1, %v1498_v56, 0.0 }
 0x26f   :  { %987 = vperm.xlu1 %1073, %v971_v55  }
 0x271   :  { %928 = vadd.xlane.f32.xlu2 %v927_v57 }
 0x27f   :  { %v175_v60 = vpop.xlane.xlu2 %174 }
 0x280   :  { %v190_v26 = vand.u32 2147483648, %v175_v60  ;;  %vm184_vm6 = vweird.f32 %v175_v60  ;;  %v188_v16 = vand.u32 2147483647, %v175_v60 }
 0x282   :  { %v191_v44 = vor.u32 1.1754944e-38, %v190_v26  ;;  %vm189_vm9 = vcmp.eq.f32.partialorder %v188_v16, 8.507059e+37 }
 0x287   :  { %v281_v63 = vpop.xlane.xlu2 %280 }
 0x288   :  { %1109 = vrcp.f32 %v281_v63  ;;  %v296_v23 = vand.u32 2147483648, %v281_v63  ;;  %vm290_vm4 = vweird.f32 %v281_v63  ;;  %v294_v15 = vand.u32 2147483647, %v281_v63 }
 0x289   :  { %992 = vperm.xlu2 %1074, %v972_v59   ;;  %1111 = vrcp.f32 %v175_v60 }
 0x28a   :  { %v297_v35 = vor.u32 1.1754944e-38, %v296_v23  ;;  %vm295_vm8 = vcmp.eq.f32.partialorder %v294_v15, 8.507059e+37 }
 0x28e   :  { %v1110_v62 = vpop.eup %1109 }
 0x28f   :  { %v1112_v0 = vpop.eup %1111  ;;  %v286_v1 = vmul.f32 %v1110_v62, %v281_v63  ;;  %vm291_vm2 = vweird.f32 %v1110_v62 }
 0x290   :  { %v180_v5 = vmul.f32 %v1112_v0, %v175_v60  ;;  %vm185_vm3 = vweird.f32 %v1112_v0  ;;  %vm1525_vm5 = vmor %vm290_vm4, %vm291_vm2 }
 0x291   :  { %v287_v6 = vsub.f32 1.0, %v286_v1  ;;  %vm186_vm7 = vmor %vm184_vm6, %vm185_vm3 }
 0x292   :  { %v181_v8 = vsub.f32 1.0, %v180_v5 }
 0x293   :  { %v288_v9 = vmul.f32 %v1110_v62, %v287_v6 }
 0x294   :  { %v182_v17 = vmul.f32 %v1112_v0, %v181_v8 }
 0x295   :  { %v289_v18 = vadd.f32 %v1110_v62, %v288_v9 }
 0x296   :  { %v183_v24 = vadd.f32 %v1112_v0, %v182_v17 }
 0x297   :  { %v293_v33 = vsel %vm1525_vm5, %v1110_v62, %v289_v18 }
 0x298   :  { %v187_v38 = vsel %vm186_vm7, %v1112_v0, %v183_v24  ;;  %v298_v45 = vsel %vm295_vm8, %v297_v35, %v293_v33 }
 0x299   :  { %v192_v27 = vsel %vm189_vm9, %v191_v44, %v187_v38  ;;  %v315_v54 = vmul.f32 %v1425_v39, %v298_v45 }
 0x29a   :  { %v209_v60 = vmul.f32 %v1421_v36, %v192_v27 }
 0x29c   :  { %v1561_v6 = vadd.f32 %v315_v54, %v209_v60 }
 0x2ac   :  { %v1505_v2 = vpop.xlane.xlu0 %283 }
 0x2ad   :  { %1113 = vrcp.f32 %v1505_v2  ;;  %v309_v55 = vand.u32 2147483647, %v1505_v2  ;;  %v311_v58 = vand.u32 2147483648, %v1505_v2  ;;  %vm305_vm12 = vweird.f32 %v1505_v2 }
 0x2af   :  { %vm1564_vm13 = vcmp.eq.f32.partialorder %v309_v55, 8.507059e+37  ;;  %v312_v18 = vor.u32 1.1754944e-38, %v311_v58 }
 0x2b1   :  { %v1507_v4 = vpop.xlane.xlu1 %391 }
 0x2b2   :  { %1115 = vrcp.f32 %v1507_v4  ;;  %v417_v59 = vand.u32 2147483647, %v1507_v4  ;;  %v419_v0 = vand.u32 2147483648, %v1507_v4  ;;  %vm413_vm15 = vweird.f32 %v1507_v4 }
 0x2b3   :  { %v1511_v10 = vpop.eup %1113 }
 0x2b4   :  { %v301_v19 = vmul.f32 %v1511_v10, %v1505_v2  ;;  %vm306_vm10 = vweird.f32 %v1511_v10  ;;  %vm1576_vm0 = vcmp.eq.f32.partialorder %v417_v59, 8.507059e+37  ;;  %v420_v30 = vor.u32 1.1754944e-38, %v419_v0 }
 0x2b5   :  { %vm1571_vm14 = vmor %vm305_vm12, %vm306_vm10 }
 0x2b6   :  { %v302_v34 = vsub.f32 1.0, %v301_v19 }
 0x2b8   :  { %v1515_v13 = vpop.eup %1115  ;;  %v303_v46 = vmul.f32 %v1511_v10, %v302_v34 }
 0x2b9   :  { %v1513_v12 = vpop.xlane.xlu1 %496  ;;  %v409_v14 = vmul.f32 %v1515_v13, %v1507_v4  ;;  %vm414_vm11 = vweird.f32 %v1515_v13 }
 0x2ba   :  { %1117 = vrcp.f32 %v1513_v12  ;;  %v304_v63 = vadd.f32 %v1511_v10, %v303_v46  ;;  %vm1586_vm2 = vmor %vm413_vm15, %vm414_vm11  ;;  %v512_v4 = vand.u32 2147483648, %v1513_v12  ;;  %vm506_vm3 = vweird.f32 %v1513_v12 }
 0x2bb   :  { %v410_v22 = vsub.f32 1.0, %v409_v14  ;;  %v510_v14 = vand.u32 2147483647, %v1513_v12 }
 0x2bc   :  { %v1520_v20 = vpop.xlane.xlu0 %607  ;;  %v308_v2 = vsel %vm1571_vm14, %v1511_v10, %v304_v63 }
 0x2bd   :  { %1119 = vrcp.f32 %v1520_v20  ;;  %v411_v28 = vmul.f32 %v1515_v13, %v410_v22  ;;  %v313_v22 = vsel %vm1564_vm13, %v312_v18, %v308_v2  ;;  %v633_v38 = vand.u32 2147483647, %v1520_v20 }
 0x2be   :  { %vm1614_vm5 = vcmp.eq.f32.partialorder %v510_v14, 8.507059e+37  ;;  %v1629_v54 = vmul.f32 %v1431_v48, %v313_v22  ;;  %vm629_vm8 = vweird.f32 %v1520_v20 }
 0x2bf   :  { %v412_v62 = vadd.f32 %v1515_v13, %v411_v28  ;;  %vm1636_vm9 = vcmp.eq.f32.partialorder %v633_v38, 8.507059e+37 }
 0x2c0   :  { %v1529_v31 = vpop.eup %1117 }
 0x2c1   :  { %v1533_v37 = vpop.xlane.xlu1 %820  ;;  %v502_v42 = vmul.f32 %v1529_v31, %v1513_v12  ;;  %v416_v10 = vsel %vm1586_vm2, %v1515_v13, %v412_v62  ;;  %vm507_vm4 = vweird.f32 %v1529_v31  ;;  %v635_v13 = vand.u32 2147483648, %v1520_v20 }
 0x2c2   :  { %1121 = vrcp.f32 %v1533_v37  ;;  %v513_v12 = vor.u32 1.1754944e-38, %v512_v4  ;;  %v836_v45 = vand.u32 2147483648, %v1533_v37  ;;  %vm1621_vm6 = vmor %vm506_vm3, %vm507_vm4  ;;  %vm830_vm11 = vweird.f32 %v1533_v37 }
 0x2c3   :  { %v1537_v21 = vpop.eup %1119  ;;  %v503_v57 = vsub.f32 1.0, %v502_v42  ;;  %v421_v42 = vsel %vm1576_vm0, %v420_v30, %v416_v10  ;;  %v636_v59 = vor.u32 1.1754944e-38, %v635_v13 }
 0x2c4   :  { %v1541_v47 = vpop.xlane.xlu2 %177  ;;  %v625_v52 = vmul.f32 %v1537_v21, %v1520_v20  ;;  %vm630_vm7 = vweird.f32 %v1537_v21  ;;  %v1643_v48 = vmul.f32 %v1436_v53, %v421_v42  ;;  %v834_v20 = vand.u32 2147483647, %v1533_v37 }
 0x2c5   :  { %1123 = vrcp.f32 %v1541_v47  ;;  %v504_v8 = vmul.f32 %v1529_v31, %v503_v57  ;;  %v203_v60 = vand.u32 2147483647, %v1541_v47  ;;  %v205_v63 = vand.u32 2147483648, %v1541_v47  ;;  %vm1645_vm10 = vmor %vm629_vm8, %vm630_vm7 }
 0x2c6   :  { %v626_v39 = vsub.f32 1.0, %v625_v52  ;;  %v837_v18 = vor.u32 1.1754944e-38, %v836_v45  ;;  %vm199_vm13 = vweird.f32 %v1541_v47  ;;  %vm1686_vm0 = vcmp.eq.f32.partialorder %v834_v20, 8.507059e+37 }
 0x2c7   :  { %v505_v34 = vadd.f32 %v1529_v31, %v504_v8  ;;  %vm1673_vm14 = vcmp.eq.f32.partialorder %v203_v60, 8.507059e+37 }
 0x2c8   :  { %v1559_v5 = vpop.eup %1121  ;;  %v627_v16 = vmul.f32 %v1537_v21, %v626_v39 }
 0x2c9   :  { %v1557_v1 = vpop.xlane.xlu1 %715  ;;  %v826_v33 = vmul.f32 %v1559_v5, %v1533_v37  ;;  %v509_v55 = vsel %vm1621_vm6, %v1529_v31, %v505_v34  ;;  %vm831_vm15 = vweird.f32 %v1559_v5 }
 0x2ca   :  { %1125 = vrcp.f32 %v1557_v1  ;;  %v628_v28 = vadd.f32 %v1537_v21, %v627_v16  ;;  %v514_v53 = vsel %vm1614_vm5, %v513_v12, %v509_v55  ;;  %v743_v4 = vand.u32 2147483648, %v1557_v1  ;;  %vm1716_vm5 = vmor %vm830_vm11, %vm831_vm15 }
 0x2cb   :  { %v1569_v9 = vpop.eup %1123  ;;  %v827_v52 = vsub.f32 1.0, %v826_v33  ;;  %v1682_v16 = vmul.f32 %v1442_v61, %v514_v53  ;;  %vm737_vm3 = vweird.f32 %v1557_v1 }
 0x2cc   :  { %v195_v24 = vmul.f32 %v1569_v9, %v1541_v47  ;;  %v1594_v15 = vpop.xlane.xlu2 %823  ;;  %v1596_v26 = vpop.xlane.xlu0 %388  ;;  %v632_v8 = vsel %vm1645_vm10, %v1537_v21, %v628_v28  ;;  %vm200_vm12 = vweird.f32 %v1569_v9  ;;  %v206_v21 = vor.u32 1.1754944e-38, %v205_v63 }
 0x2cd   :  { %1127 = vrcp.f32 %v1596_v26  ;;  %v828_v17 = vmul.f32 %v1559_v5, %v827_v52  ;;  %vm1692_vm2 = vmor %vm199_vm13, %vm200_vm12  ;;  %v1708_v42 = vor.u32 1.1754944e-38, %v743_v4  ;;  %v402_v44 = vand.u32 2147483647, %v1596_v26 }
 0x2ce   :  { %v196_v35 = vsub.f32 1.0, %v195_v24  ;;  %1129 = vrcp.f32 %v1594_v15  ;;  %v637_v24 = vsel %vm1636_vm9, %v636_v59, %v632_v8  ;;  %v404_v12 = vand.u32 2147483648, %v1596_v26 }
 0x2cf   :  { %v829_v33 = vadd.f32 %v1559_v5, %v828_v17  ;;  %v1706_v13 = vmul.f32 %v1447_v3, %v637_v24  ;;  %v849_v28 = vand.u32 2147483647, %v1594_v15  ;;  %vm398_vm6 = vweird.f32 %v1596_v26 }
 0x2d0   :  { %v1619_v46 = vpop.eup %1125  ;;  %v197_v57 = vmul.f32 %v1569_v9, %v196_v35  ;;  %v741_v35 = vand.u32 2147483647, %v1557_v1  ;;  %vm403_vm9 = vcmp.eq.f32.partialorder %v402_v44, 8.507059e+37  ;;  %v405_v62 = vor.u32 1.1754944e-38, %v404_v12 }
 0x2d1   :  { %v733_v31 = vmul.f32 %v1619_v46, %v1557_v1  ;;  %v833_v55 = vsel %vm1716_vm5, %v1559_v5, %v829_v33  ;;  %vm738_vm8 = vweird.f32 %v1619_v46  ;;  %vm845_vm10 = vweird.f32 %v1594_v15 }
 0x2d2   :  { %v198_v19 = vadd.f32 %v1569_v9, %v197_v57  ;;  %v851_v57 = vand.u32 2147483648, %v1594_v15  ;;  %vm1756_vm11 = vcmp.eq.f32.partialorder %v741_v35, 8.507059e+37 }
 0x2d3   :  { %v1657_v36 = vpop.eup %1127  ;;  %v734_v10 = vsub.f32 1.0, %v733_v31 }
 0x2d4   :  { %v1653_v0 = vpop.xlane.xlu2 %604  ;;  %v1655_v39 = vpop.xlane.xlu0 %712  ;;  %v394_v2 = vmul.f32 %v1657_v36, %v1596_v26  ;;  %v202_v61 = vsel %vm1692_vm2, %v1569_v9, %v198_v19  ;;  %vm399_vm4 = vweird.f32 %v1657_v36  ;;  %v1768_v4 = vor.u32 1.1754944e-38, %v851_v57  ;;  %v974_v9 = vld [vmem:[#allocation2 + $0x8] sm:$0xff] }
 0x2d5   :  { %1131 = vrcp.f32 %v1653_v0  ;;  %v1670_v23 = vpop.eup %1129  ;;  %v735_v27 = vmul.f32 %v1619_v46, %v734_v10  ;;  %v207_v37 = vsel %vm1673_vm14, %v206_v21, %v202_v61  ;;  %vm1734_vm7 = vmor %vm398_vm6, %vm399_vm4  ;;  %v620_v17 = vand.u32 2147483648, %v1653_v0 }
 0x2d6   :  { %v395_v30 = vsub.f32 1.0, %v394_v2  ;;  %1133 = vrcp.f32 %v1655_v39  ;;  %v841_v22 = vmul.f32 %v1670_v23, %v1594_v15  ;;  %v210_v53 = vmul.f32 %v1458_v11, %v207_v37  ;;  %vm1774_vm14 = vmor %vm737_vm3, %vm738_vm8 }
 0x2d7   :  { %v736_v8 = vadd.f32 %v1619_v46, %v735_v27  ;;  %v1764_v11 = vsel %vm1686_vm0, %v837_v18, %v833_v55  ;;  %vm846_vm13 = vweird.f32 %v1670_v23  ;;  %vm614_vm15 = vweird.f32 %v1653_v0 }
 0x2d8   :  { %v396_v38 = vmul.f32 %v1657_v36, %v395_v30  ;;  %v842_v5 = vsub.f32 1.0, %v841_v22  ;;  %v618_v18 = vand.u32 2147483647, %v1653_v0  ;;  %v318_v47 = vadd.f32 %v1629_v54, %v210_v53 }
 0x2d9   :  { %v740_v34 = vsel %vm1774_vm14, %v1619_v46, %v736_v8  ;;  %v621_v61 = vor.u32 1.1754944e-38, %v620_v17  ;;  %v726_v44 = vand.u32 2147483647, %v1655_v39  ;;  %v728_v12 = vand.u32 2147483648, %v1655_v39 }
 0x2da   :  { %v397_v3 = vadd.f32 %v1657_v36, %v396_v38  ;;  %v843_v21 = vmul.f32 %v1670_v23, %v842_v5  ;;  %vm1807_vm3 = vcmp.eq.f32.partialorder %v849_v28, 8.507059e+37  ;;  %vm619_vm4 = vcmp.eq.f32.partialorder %v618_v18, 8.507059e+37 }
 0x2db   :  { %v1712_v45 = vpop.eup %1131  ;;  %vm722_vm5 = vweird.f32 %v1655_v39  ;;  %v745_v5 = vsel %vm1756_vm11, %v1708_v42, %v740_v34  ;;  %v729_v15 = vor.u32 1.1754944e-38, %v728_v12 }
 0x2dc   :  { %v1724_v52 = vpop.xlane.xlu2 %499  ;;  %v610_v26 = vmul.f32 %v1712_v45, %v1653_v0  ;;  %v1740_v59 = vpop.xlane.xlu0 %931  ;;  %v401_v63 = vsel %vm1734_vm7, %v1657_v36, %v397_v3  ;;  %vm615_vm12 = vweird.f32 %v1712_v45  ;;  %v844_v38 = vadd.f32 %v1670_v23, %v843_v21  ;;  %vm1825_vm7 = vmor %vm845_vm10, %vm846_vm13 }
 0x2dd   :  { %v1742_v60 = vpop.eup %1133  ;;  %1135 = vrcp.f32 %v1724_v52  ;;  %v406_v19 = vsel %vm403_vm9, %v405_v62, %v401_v63  ;;  %vm1789_vm0 = vmor %vm614_vm15, %vm615_vm12  ;;  %v525_v57 = vand.u32 2147483647, %v1724_v52  ;;  %v527_v28 = vand.u32 2147483648, %v1724_v52 }
 0x2de   :  { %v611_v20 = vsub.f32 1.0, %v610_v26  ;;  %v718_v31 = vmul.f32 %v1742_v60, %v1655_v39  ;;  %1137 = vrcp.f32 %v1740_v59  ;;  %v423_v1 = vmul.f32 %v1470_v32, %v406_v19 }
 0x2df   :  { %vm723_vm2 = vweird.f32 %v1742_v60  ;;  %v848_v63 = vsel %vm1825_vm7, %v1670_v23, %v844_v38  ;;  %vm727_vm9 = vcmp.eq.f32.partialorder %v726_v44, 8.507059e+37  ;;  %vm521_vm10 = vweird.f32 %v1724_v52 }
 0x2e0   :  { %v612_v2 = vmul.f32 %v1712_v45, %v611_v20  ;;  %v719_v14 = vsub.f32 1.0, %v718_v31  ;;  %v425_v3 = vadd.f32 %v423_v1, %v1561_v6  ;;  %vm1815_vm6 = vmor %vm722_vm5, %vm723_vm2  ;;  %vm526_vm13 = vcmp.eq.f32.partialorder %v525_v57, 8.507059e+37 }
 0x2e1   :  { %v528_v8 = vor.u32 1.1754944e-38, %v527_v28  ;;  %vm953_vm14 = vweird.f32 %v1740_v59  ;;  %v853_v24 = vsel %vm1807_vm3, %v1768_v4, %v848_v63  ;;  %v988_v37 = vpop.permute.xlu1 %987 }
 0x2e2   :  { %v613_v10 = vadd.f32 %v1712_v45, %v612_v2  ;;  %v720_v30 = vmul.f32 %v1742_v60, %v719_v14  ;;  %v533_v42 = vadd.f32 %v1682_v16, %v425_v3  ;;  %v959_v2 = vand.u32 2147483648, %v1740_v59 }
 0x2e3   :  { %v1136_v33 = vpop.eup %1135 }
 0x2e4   :  { %v1793_v22 = vpop.xlane.xlu2 %928  ;;  %v617_v0 = vsel %vm1789_vm0, %v1712_v45, %v613_v10  ;;  %v721_v54 = vadd.f32 %v1742_v60, %v720_v30  ;;  %v517_v46 = vmul.f32 %v1136_v33, %v1724_v52  ;;  %v1801_v32 = vpop.eup %1137  ;;  %vm522_vm8 = vweird.f32 %v1136_v33 }
 0x2e5   :  { %1139 = vrcp.f32 %v1793_v22  ;;  %v949_v27 = vmul.f32 %v1801_v32, %v1740_v59  ;;  %v622_v55 = vsel %vm619_vm4, %v621_v61, %v617_v0  ;;  %vm523_vm12 = vmor %vm521_vm10, %vm522_vm8  ;;  %vm954_vm11 = vweird.f32 %v1801_v32 }
 0x2e6   :  { %v518_v45 = vsub.f32 1.0, %v517_v46  ;;  %v725_v6 = vsel %vm1815_vm6, %v1742_v60, %v721_v54  ;;  %v639_v62 = vmul.f32 %v1477_v40, %v622_v55  ;;  %v426_v40 = vadd.f32 %v1643_v48, %v318_v47  ;;  %vm1854_vm15 = vmor %vm953_vm14, %vm954_vm11 }
 0x2e7   :  { %v950_v26 = vsub.f32 1.0, %v949_v27  ;;  %v730_v53 = vsel %vm727_vm9, %v729_v15, %v725_v6  ;;  %v957_v52 = vand.u32 2147483647, %v1740_v59  ;;  %v942_v48 = vand.u32 2147483647, %v1793_v22 }
 0x2e8   :  { %v519_v58 = vmul.f32 %v1136_v33, %v518_v45  ;;  %v641_v16 = vsub.f32 %v533_v42, %v639_v62  ;;  %v747_v10 = vmul.f32 %v1480_v43, %v730_v53  ;;  %v944_v30 = vand.u32 2147483648, %v1793_v22 }
 0x2e9   :  { %v951_v60 = vmul.f32 %v1801_v32, %v950_v26  ;;  %v748_v47 = vmul.f32 %v1463_v25, %v745_v5  ;;  %vm958_vm2 = vcmp.eq.f32.partialorder %v957_v52, 8.507059e+37  ;;  %v960_v4 = vor.u32 1.1754944e-38, %v959_v2 }
 0x2ea   :  { %v520_v20 = vadd.f32 %v1136_v33, %v519_v58  ;;  %v855_v43 = vmul.f32 %v1453_v7, %v1764_v11  ;;  %vm938_vm3 = vweird.f32 %v1793_v22  ;;  %v749_v1 = vsub.f32 %v641_v16, %v747_v10 }
 0x2eb   :  { %v1140_v31 = vpop.eup %1139  ;;  %v952_v36 = vadd.f32 %v1801_v32, %v951_v60  ;;  %v945_v0 = vor.u32 1.1754944e-38, %v944_v30  ;;  %v967_v54 = vsub.f32 1.0, %v1336_v41  ;;  %v856_v46 = vmul.f32 %v1465_v29, %v853_v24 }
 0x2ec   :  { %v524_v17 = vsel %vm523_vm12, %v1136_v33, %v520_v20  ;;  %v934_v23 = vmul.f32 %v1140_v31, %v1793_v22  ;;  %vm939_vm0 = vweird.f32 %v1140_v31  ;;  %vm943_vm5 = vcmp.eq.f32.partialorder %v942_v48, 8.507059e+37  ;;  %v993_v57 = vpop.permute.xlu2 %992 }
 0x2ed   :  { %v529_v19 = vsel %vm526_vm13, %v528_v8, %v524_v17  ;;  %vm940_vm4 = vmor %vm938_vm3, %vm939_vm0  ;;  %v857_v7 = vsub.f32 %v749_v1, %v855_v43  ;;  %v979_v45 = vperm.slane %v967_v54, 0 }
 0x2ee   :  { %v532_v14 = vmul.f32 %v1487_v49, %v529_v19  ;;  %v935_v21 = vsub.f32 1.0, %v934_v23  ;;  %v956_v49 = vsel %vm1854_vm15, %v1801_v32, %v952_v36  ;;  %v968_v32 = vsub.f32 1.0, %v1354_v50 }
 0x2ef   :  { %v961_v61 = vsel %vm958_vm2, %v960_v4, %v956_v49 }
 0x2f0   :  { %v534_v33 = vadd.f32 %v532_v14, %v426_v40  ;;  %v936_v59 = vmul.f32 %v1140_v31, %v935_v21  ;;  %v964_v12 = vmul.f32 %v1489_v51, %v961_v61  ;;  %v980_v3 = vperm.slane %v968_v32, 0 }
 0x2f2   :  { %v937_v34 = vadd.f32 %v1140_v31, %v936_v59  ;;  %v642_v35 = vsub.f32 %v534_v33, %v1706_v13  ;;  %v973_v13 = vld [vmem:[#allocation2] sm:$0xff] }
 0x2f4   :  { %v941_v25 = vsel %vm940_vm4, %v1140_v31, %v937_v34  ;;  %v750_v38 = vsub.f32 %v642_v35, %v748_v47 }
 0x2f5   :  { %v946_v44 = vsel %vm943_vm5, %v945_v0, %v941_v25 }
 0x2f6   :  { %v963_v11 = vmul.f32 %v1498_v56, %v946_v44  ;;  %v858_v22 = vsub.f32 %v750_v38, %v856_v46 }
 0x2f8   :  { %v965_v27 = vsub.f32 %v857_v7, %v963_v11  ;;  %v966_v41 = vsub.f32 %v858_v22, %v964_v12 }
 0x2fa   :  { %v975_v55 = vadd.f32 %v973_v13, %v965_v27  ;;  %v976_v29 = vadd.f32 %v974_v9, %v966_v41 }
 0x2fc   :  { %v983_v28 = vmul.f32 %v979_v45, %v975_v55  ;;  %v984_v50 = vmul.f32 %v980_v3, %v976_v29 }
 0x2fe   :  { %v995_v56 = vmul.f32 %v988_v37, %v983_v28  ;;  %v996_v51 = vmul.f32 %v993_v57, %v984_v50 }
 0x300   :  { %997 = vst.msk [vmem:[#allocation7] sm:$0xff] %vm109_vm1, %v995_v56 }
 0x301   :  { %998 = vst.msk [vmem:[#allocation7 + $0x8] sm:$0xff] %vm109_vm1, %v996_v51 }
 0x302   :  { %1011 = dma.vmem_to_hbm [thread:$0]  %s1004_s4, 256, %s1006_s11, [#allocation4], %s1220_s29, %s1220_s29, %s1221_s30  }
 0x303   :  { %1217 = dma.done.wait [#allocation4], 256  }
 0x304   :  { %1218 = vsyncadd [#allocation4], 4294967040 }
 0x305   :  { %1016 = vsyncpa [#allocation3], 1 }
 0x306   :  { %1017 = vsyncpa [#allocation6], 1 }
 0x307   :  { %1018 = vsyncpa [#allocation4], 1 }

</bundles_post_ra>
